<compile_context>
chip_gen: v7x
topology: tpu7x:2x2x1
jax: 0.10.0
libtpu: 0.0.40
codegen_flags: <defaults>
</compile_context>

<pallas_src>
import functools
import math

import jax
import jax.numpy as jnp
from jax import lax
from jax.experimental import pallas as pl
from jax.experimental.pallas import tpu as pltpu


def _conv2d_embeddings_kernel(word_ref, prev_ref, next_ref, pconv_ref,
                              convw_ref, gamma_ref, beta_ref, out_ref,
                              *, ts, hidden, eps):
    """One (S-tile, batch) pair per grid step.

    word_ref  : (1, ts, H) f32  word embeddings, current S tile
    prev_ref  : (1, 8, H)  f32  8-row block whose LAST row is the row above the tile
    next_ref  : (1, 8, H)  f32  8-row block whose FIRST row is the row below the tile
    pconv_ref : (1, ts, H) f32  precomputed position-channel conv (batch-invariant)
    convw_ref : (9,) f32 in SMEM, word-channel 3x3 conv weights, row-major
    gamma/beta: (1, H) f32 LayerNorm affine params
    out_ref   : (1, ts, H) f32
    """
    s = pl.program_id(0)
    ns = pl.num_programs(0)

    x = word_ref[0]          # (ts, H)
    pconv = pconv_ref[0]     # (ts, H)

    # Cross-tile neighbor rows; forced to zero at the true sequence edges
    # (emulates the conv's zero padding along S).
    above_row = prev_ref[0, 7:8, :] * jnp.where(s > 0, 1.0, 0.0)        # (1, H)
    below_row = next_ref[0, 0:1, :] * jnp.where(s < ns - 1, 1.0, 0.0)   # (1, H)

    row = lax.broadcasted_iota(jnp.int32, (ts, 1), 0)
    col = lax.broadcasted_iota(jnp.int32, (1, hidden), 1)

    # Row-shifted views of the word channel (XLU sublane rolls + edge fix-up).
    x_up = pltpu.roll(x, 1, 0)                      # row i <- x[i-1]
    x_up = jnp.where(row == 0, above_row, x_up)
    x_dn = pltpu.roll(x, ts - 1, 0)                 # row i <- x[i+1]
    x_dn = jnp.where(row == ts - 1, below_row, x_dn)

    # w[kr, kc] multiplies x[i + kr - 1, j + kc - 1] (3x3, padding=1, no bias).
    def wk(kr, kc):
        return convw_ref[kr * 3 + kc]

    # Per-column-offset weighted row sums (scalar * array on the VPU).
    s_m1 = wk(0, 0) * x_up + wk(1, 0) * x + wk(2, 0) * x_dn   # needs shift j-1
    s_0 = wk(0, 1) * x_up + wk(1, 1) * x + wk(2, 1) * x_dn    # kc = 0 offset
    s_p1 = wk(0, 2) * x_up + wk(1, 2) * x + wk(2, 2) * x_dn   # needs shift j+1

    # Column shifts via lane rolls; mask wrapped edge column (zero pad along H).
    t_m1 = pltpu.roll(s_m1, 1, 1)                   # col j <- s_m1[:, j-1]
    t_m1 = jnp.where(col == 0, 0.0, t_m1)
    t_p1 = pltpu.roll(s_p1, hidden - 1, 1)          # col j <- s_p1[:, j+1]
    t_p1 = jnp.where(col == hidden - 1, 0.0, t_p1)

    acc = pconv + s_0 + t_m1 + t_p1

    # Exact GELU (PyTorch nn.GELU default, approximate='none').
    g = 0.5 * acc * (1.0 + lax.erf(acc * (1.0 / math.sqrt(2.0))))

    # Single-pass LayerNorm statistics over H (clamp var for numerical safety).
    s1 = jnp.sum(g, axis=-1, keepdims=True)
    s2 = jnp.sum(g * g, axis=-1, keepdims=True)
    mean = s1 * (1.0 / hidden)
    var = jnp.maximum(s2 * (1.0 / hidden) - mean * mean, 0.0)
    inv = lax.rsqrt(var + eps)
    y = (g - mean) * inv * gamma_ref[...] + beta_ref[...]

    out_ref[0] = y.astype(out_ref.dtype)
    # TODO(synk): dropout is a no-op in eval mode; not implemented in-kernel.


def _choose_tile(s_pad, hidden):
    """S-tile size: multiple of 8, divides s_pad, keeps the VMEM working set small."""
    cap_rows = max(8, ((1 << 20) // max(hidden, 1)) // 8 * 8)
    t = min(s_pad, 512, cap_rows)
    t = max(8, (t // 8) * 8)
    while s_pad % t:
        t -= 8
    return t


def conv2d_embeddings(input_ids, params, *, eps=1e-12):
    """JAX wrapper reproducing Conv2DEmbeddings.forward(input_ids) (eval mode)."""
    B, S = input_ids.shape
    H = params["word_emb"].shape[1]

    # Embedding lookups (glue, plain JAX).
    word = jnp.take(params["word_emb"], input_ids, axis=0).astype(jnp.float32)     # (B, S, H)
    pos = jnp.take(params["pos_emb"], jnp.arange(S, dtype=jnp.int32),
                   axis=0).astype(jnp.float32)                                     # (S, H)

    conv_w = params["conv_w"].astype(jnp.float32)                                  # (1, 2, 3, 3)

    # Batch-invariant position-channel convolution, computed exactly once.
    pos_conv = lax.conv_general_dilated(
        pos[None, None], conv_w[:, 1:2], (1, 1), ((1, 1), (1, 1)),
        dimension_numbers=("NCHW", "OIHW", "NCHW"))[0, 0]                          # (S, H)

    # Round S up to a multiple of 8 (sublane) so the halo row-blocks are legal.
    # Appended rows are zero, which matches the conv's zero padding; the extra
    # output rows are sliced off at the end.
    S8 = -(-S // 8) * 8
    if S8 != S:
        word = jnp.pad(word, ((0, 0), (0, S8 - S), (0, 0)))
        pos_conv = jnp.pad(pos_conv, ((0, S8 - S), (0, 0)))
    pos_conv = pos_conv[None]                                                      # (1, S8, H)

    tS = _choose_tile(S8, H)
    nS = S8 // tS
    R = tS // 8                     # 8-row blocks per S tile (for halo indexing)
    last8 = S8 // 8 - 1             # last 8-row block index

    convw_word = conv_w[0, 0].reshape(-1)                                          # (9,)
    gamma = params["ln_gamma"].reshape(1, H).astype(jnp.float32)
    beta = params["ln_beta"].reshape(1, H).astype(jnp.float32)

    kernel = functools.partial(_conv2d_embeddings_kernel, ts=tS, hidden=H, eps=eps)

    out = pl.pallas_call(
        kernel,
        out_shape=jax.ShapeDtypeStruct((B, S8, H), jnp.float32),
        grid=(nS, B),   # batch innermost -> pos_conv tile stays VMEM-resident across b
        in_specs=[
            # word embeddings, current S tile
            pl.BlockSpec((1, tS, H), lambda s, b: (b, s, 0)),
            # previous-row halo: 8-row block whose last row is row s*tS - 1
            pl.BlockSpec((1, 8, H), lambda s, b: (b, jnp.maximum(s * R - 1, 0), 0)),
            # next-row halo: 8-row block whose first row is row (s+1)*tS
            pl.BlockSpec((1, 8, H), lambda s, b: (b, jnp.minimum((s + 1) * R, last8), 0)),
            # batch-invariant position-channel conv (index independent of b)
            pl.BlockSpec((1, tS, H), lambda s, b: (0, s, 0)),
            # word-channel conv weights, scalar reads from SMEM
            pl.BlockSpec(memory_space=pltpu.MemorySpace.SMEM),
            pl.BlockSpec((1, H), lambda s, b: (0, 0)),
            pl.BlockSpec((1, H), lambda s, b: (0, 0)),
        ],
        out_specs=pl.BlockSpec((1, tS, H), lambda s, b: (b, s, 0)),
        compiler_params=pltpu.CompilerParams(
            dimension_semantics=("parallel", "parallel"),
            vmem_limit_bytes=32 * 1024 * 1024),
    )(word, word, word, pos_conv, convw_word, gamma, beta)

    return out[:, :S, :]


def _reference(input_ids, params, eps=1e-12):
    """Pure-JAX reference matching the PyTorch forward (eval mode)."""
    word = jnp.take(params["word_emb"], input_ids, axis=0)
    S = input_ids.shape[1]
    pos = jnp.take(params["pos_emb"], jnp.arange(S), axis=0)[None]
    pos = jnp.broadcast_to(pos, word.shape)
    x = jnp.stack([word, pos], axis=1)                              # (B, 2, S, H)  NCHW
    conv = lax.conv_general_dilated(
        x, params["conv_w"], window_strides=(1, 1),
        padding=((1, 1), (1, 1)),
        dimension_numbers=("NCHW", "OIHW", "NCHW"))                 # (B, 1, S, H)
    g = jax.nn.gelu(conv[:, 0], approximate=False)
    mean = g.mean(-1, keepdims=True)
    var = ((g - mean) ** 2).mean(-1, keepdims=True)
    return (g - mean) / jnp.sqrt(var + eps) * params["ln_gamma"] + params["ln_beta"]


if __name__ == "__main__":
    # Small, deterministic config (H chosen lane-native: 128).
    vocab_size = 50
    hidden_size = 128
    max_position_embeddings = 16
    pad_token_id = 0
    layer_norm_eps = 1e-12
    B, S = 2, 8

    key = jax.random.PRNGKey(0)
    k_word, k_pos, k_conv, k_ids = jax.random.split(key, 4)

    word_emb = 0.02 * jax.random.normal(k_word, (vocab_size, hidden_size), jnp.float32)
    word_emb = word_emb.at[pad_token_id].set(0.0)                   # padding_idx row = 0
    pos_emb = 0.02 * jax.random.normal(k_pos, (max_position_embeddings, hidden_size), jnp.float32)
    conv_w = 0.1 * jax.random.normal(k_conv, (1, 2, 3, 3), jnp.float32)  # (out=1, in=2, 3, 3)
    params = {
        "word_emb": word_emb,
        "pos_emb": pos_emb,
        "conv_w": conv_w,
        "ln_gamma": jnp.ones((hidden_size,), jnp.float32),
        "ln_beta": jnp.zeros((hidden_size,), jnp.float32),
    }

    input_ids = jax.random.randint(k_ids, (B, S), 0, vocab_size, dtype=jnp.int32)

    out = conv2d_embeddings(input_ids, params, eps=layer_norm_eps)
    out = jax.block_until_ready(out)

    ref = _reference(input_ids, params, eps=layer_norm_eps)
    assert out.shape == (B, S, hidden_size), out.shape
    assert jnp.allclose(out, ref, atol=2e-3, rtol=2e-3), float(jnp.max(jnp.abs(out - ref)))

    print("KERNEL_OK")
</pallas_src>

<mosaic_0001>
module attributes {stable_mosaic.version = 11 : i64} {
  func.func @_conv2d_embeddings_kernel(%arg0: i32, %arg1: i32, %arg2: memref<1x8x128xf32, #tpu.memory_space<vmem>>, %arg3: memref<1x8x128xf32, #tpu.memory_space<vmem>>, %arg4: memref<1x8x128xf32, #tpu.memory_space<vmem>>, %arg5: memref<1x8x128xf32, #tpu.memory_space<vmem>>, %arg6: memref<9xf32, #tpu.memory_space<smem>>, %arg7: memref<1x128xf32, #tpu.memory_space<vmem>>, %arg8: memref<1x128xf32, #tpu.memory_space<vmem>>, %arg9: memref<1x8x128xf32, #tpu.memory_space<vmem>>) attributes {dimension_semantics = [#tpu.dimension_semantics<parallel>, #tpu.dimension_semantics<parallel>], iteration_bounds = array<i64: 1, 2>, scalar_prefetch = 0 : i64, scratch_operands = 0 : i64, tpu.core_type = #tpu.core_type<tc>, window_params = [{transform_indices = @transform_0, window_bounds = array<i64: 1, 8, 128>}, {transform_indices = @transform_1, window_bounds = array<i64: 1, 8, 128>}, {transform_indices = @transform_2, window_bounds = array<i64: 1, 8, 128>}, {transform_indices = @transform_3, window_bounds = array<i64: 1, 8, 128>}, {transform_indices = @transform_4, window_bounds = array<i64: 9>}, {pipeline_mode = #tpu.pipeline_mode<synchronous>, transform_indices = @transform_5, window_bounds = array<i64: 1, 128>}, {pipeline_mode = #tpu.pipeline_mode<synchronous>, transform_indices = @transform_6, window_bounds = array<i64: 1, 128>}, {transform_indices = @transform_7, window_bounds = array<i64: 1, 8, 128>}]} {
    %c0 = arith.constant 0 : index
    %c0_0 = arith.constant 0 : index
    %c0_1 = arith.constant 0 : index
    %0 = vector.load %arg2[%c0, %c0_0, %c0_1] : memref<1x8x128xf32, #tpu.memory_space<vmem>>, vector<1x8x128xf32>
    %1 = vector.shape_cast %0 : vector<1x8x128xf32> to vector<8x128xf32>
    %c0_2 = arith.constant 0 : index
    %c0_3 = arith.constant 0 : index
    %c0_4 = arith.constant 0 : index
    %2 = vector.load %arg5[%c0_2, %c0_3, %c0_4] : memref<1x8x128xf32, #tpu.memory_space<vmem>>, vector<1x8x128xf32>
    %3 = vector.shape_cast %2 : vector<1x8x128xf32> to vector<8x128xf32>
    %c0_5 = arith.constant 0 : index
    %c7 = arith.constant 7 : index
    %c0_6 = arith.constant 0 : index
    %4 = vector.load %arg3[%c0_5, %c7, %c0_6] : memref<1x8x128xf32, #tpu.memory_space<vmem>>, vector<1x1x128xf32>
    %5 = vector.shape_cast %4 : vector<1x1x128xf32> to vector<1x128xf32>
    %c0_i32 = arith.constant 0 : i32
    %6 = arith.cmpi sgt, %arg0, %c0_i32 : i32
    %cst = arith.constant 1.000000e+00 : f32
    %cst_7 = arith.constant 0.000000e+00 : f32
    %7 = arith.select %6, %cst, %cst_7 : f32
    %8 = vector.broadcast %7 : f32 to vector<1x128xf32>
    %9 = arith.mulf %5, %8 : vector<1x128xf32>
    %c0_8 = arith.constant 0 : index
    %c0_9 = arith.constant 0 : index
    %c0_10 = arith.constant 0 : index
    %10 = vector.load %arg4[%c0_8, %c0_9, %c0_10] : memref<1x8x128xf32, #tpu.memory_space<vmem>>, vector<1x1x128xf32>
    %11 = vector.shape_cast %10 : vector<1x1x128xf32> to vector<1x128xf32>
    %c0_i32_11 = arith.constant 0 : i32
    %12 = arith.cmpi slt, %arg0, %c0_i32_11 : i32
    %cst_12 = arith.constant 1.000000e+00 : f32
    %cst_13 = arith.constant 0.000000e+00 : f32
    %13 = arith.select %12, %cst_12, %cst_13 : f32
    %14 = vector.broadcast %13 : f32 to vector<1x128xf32>
    %15 = arith.mulf %11, %14 : vector<1x128xf32>
    %16 = tpu.iota {dimensions = array<i32: 0>} : vector<8x1xi32>
    %17 = tpu.iota {dimensions = array<i32: 1>} : vector<1x128xi32>
    %c1_i32 = arith.constant 1 : i32
    %18 = tpu.dynamic_rotate %1 by %c1_i32 dim 0 : vector<8x128xf32>, i32 -> vector<8x128xf32>
    %c0_i32_14 = arith.constant 0 : i32
    %19 = vector.broadcast %c0_i32_14 : i32 to vector<8x1xi32>
    %20 = arith.cmpi eq, %16, %19 : vector<8x1xi32>
    %21 = vector.shape_cast %20 : vector<8x1xi1> to vector<8x1xi1>
    %22 = vector.broadcast %21 : vector<8x1xi1> to vector<8x128xi1>
    %23 = vector.shape_cast %9 : vector<1x128xf32> to vector<1x128xf32>
    %24 = vector.broadcast %23 : vector<1x128xf32> to vector<8x128xf32>
    %25 = arith.select %22, %24, %18 : vector<8x128xi1>, vector<8x128xf32>
    %c7_i32 = arith.constant 7 : i32
    %26 = tpu.dynamic_rotate %1 by %c7_i32 dim 0 : vector<8x128xf32>, i32 -> vector<8x128xf32>
    %c7_i32_15 = arith.constant 7 : i32
    %27 = vector.broadcast %c7_i32_15 : i32 to vector<8x1xi32>
    %28 = arith.cmpi eq, %16, %27 : vector<8x1xi32>
    %29 = vector.shape_cast %28 : vector<8x1xi1> to vector<8x1xi1>
    %30 = vector.broadcast %29 : vector<8x1xi1> to vector<8x128xi1>
    %31 = vector.shape_cast %15 : vector<1x128xf32> to vector<1x128xf32>
    %32 = vector.broadcast %31 : vector<1x128xf32> to vector<8x128xf32>
    %33 = arith.select %30, %32, %26 : vector<8x128xi1>, vector<8x128xf32>
    %c0_16 = arith.constant 0 : index
    %34 = memref.load %arg6[%c0_16] : memref<9xf32, #tpu.memory_space<smem>>
    %35 = vector.broadcast %34 : f32 to vector<8x128xf32>
    %36 = arith.mulf %35, %25 : vector<8x128xf32>
    %c3 = arith.constant 3 : index
    %37 = memref.load %arg6[%c3] : memref<9xf32, #tpu.memory_space<smem>>
    %38 = vector.broadcast %37 : f32 to vector<8x128xf32>
    %39 = arith.mulf %38, %1 : vector<8x128xf32>
    %40 = arith.addf %36, %39 : vector<8x128xf32>
    %c6 = arith.constant 6 : index
    %41 = memref.load %arg6[%c6] : memref<9xf32, #tpu.memory_space<smem>>
    %42 = vector.broadcast %41 : f32 to vector<8x128xf32>
    %43 = arith.mulf %42, %33 : vector<8x128xf32>
    %44 = arith.addf %40, %43 : vector<8x128xf32>
    %c1 = arith.constant 1 : index
    %45 = memref.load %arg6[%c1] : memref<9xf32, #tpu.memory_space<smem>>
    %46 = vector.broadcast %45 : f32 to vector<8x128xf32>
    %47 = arith.mulf %46, %25 : vector<8x128xf32>
    %c4 = arith.constant 4 : index
    %48 = memref.load %arg6[%c4] : memref<9xf32, #tpu.memory_space<smem>>
    %49 = vector.broadcast %48 : f32 to vector<8x128xf32>
    %50 = arith.mulf %49, %1 : vector<8x128xf32>
    %51 = arith.addf %47, %50 : vector<8x128xf32>
    %c7_17 = arith.constant 7 : index
    %52 = memref.load %arg6[%c7_17] : memref<9xf32, #tpu.memory_space<smem>>
    %53 = vector.broadcast %52 : f32 to vector<8x128xf32>
    %54 = arith.mulf %53, %33 : vector<8x128xf32>
    %55 = arith.addf %51, %54 : vector<8x128xf32>
    %c2 = arith.constant 2 : index
    %56 = memref.load %arg6[%c2] : memref<9xf32, #tpu.memory_space<smem>>
    %57 = vector.broadcast %56 : f32 to vector<8x128xf32>
    %58 = arith.mulf %57, %25 : vector<8x128xf32>
    %c5 = arith.constant 5 : index
    %59 = memref.load %arg6[%c5] : memref<9xf32, #tpu.memory_space<smem>>
    %60 = vector.broadcast %59 : f32 to vector<8x128xf32>
    %61 = arith.mulf %60, %1 : vector<8x128xf32>
    %62 = arith.addf %58, %61 : vector<8x128xf32>
    %c8 = arith.constant 8 : index
    %63 = memref.load %arg6[%c8] : memref<9xf32, #tpu.memory_space<smem>>
    %64 = vector.broadcast %63 : f32 to vector<8x128xf32>
    %65 = arith.mulf %64, %33 : vector<8x128xf32>
    %66 = arith.addf %62, %65 : vector<8x128xf32>
    %c1_i32_18 = arith.constant 1 : i32
    %67 = tpu.dynamic_rotate %44 by %c1_i32_18 dim 1 : vector<8x128xf32>, i32 -> vector<8x128xf32>
    %c0_i32_19 = arith.constant 0 : i32
    %68 = vector.broadcast %c0_i32_19 : i32 to vector<1x128xi32>
    %69 = arith.cmpi eq, %17, %68 : vector<1x128xi32>
    %cst_20 = arith.constant 0.000000e+00 : f32
    %70 = vector.shape_cast %69 : vector<1x128xi1> to vector<1x128xi1>
    %71 = vector.broadcast %70 : vector<1x128xi1> to vector<8x128xi1>
    %72 = vector.broadcast %cst_20 : f32 to vector<8x128xf32>
    %73 = arith.select %71, %72, %67 : vector<8x128xi1>, vector<8x128xf32>
    %c127_i32 = arith.constant 127 : i32
    %74 = tpu.dynamic_rotate %66 by %c127_i32 dim 1 : vector<8x128xf32>, i32 -> vector<8x128xf32>
    %c127_i32_21 = arith.constant 127 : i32
    %75 = vector.broadcast %c127_i32_21 : i32 to vector<1x128xi32>
    %76 = arith.cmpi eq, %17, %75 : vector<1x128xi32>
    %cst_22 = arith.constant 0.000000e+00 : f32
    %77 = vector.shape_cast %76 : vector<1x128xi1> to vector<1x128xi1>
    %78 = vector.broadcast %77 : vector<1x128xi1> to vector<8x128xi1>
    %79 = vector.broadcast %cst_22 : f32 to vector<8x128xf32>
    %80 = arith.select %78, %79, %74 : vector<8x128xi1>, vector<8x128xf32>
    %81 = arith.addf %3, %55 : vector<8x128xf32>
    %82 = arith.addf %81, %73 : vector<8x128xf32>
    %83 = arith.addf %82, %80 : vector<8x128xf32>
    %cst_23 = arith.constant 5.000000e-01 : f32
    %84 = vector.broadcast %cst_23 : f32 to vector<8x128xf32>
    %85 = arith.mulf %84, %83 : vector<8x128xf32>
    %cst_24 = arith.constant 0.707106769 : f32
    %86 = vector.broadcast %cst_24 : f32 to vector<8x128xf32>
    %87 = arith.mulf %83, %86 : vector<8x128xf32>
    %88 = math.erf %87 : vector<8x128xf32>
    %cst_25 = arith.constant 1.000000e+00 : f32
    %89 = vector.broadcast %cst_25 : f32 to vector<8x128xf32>
    %90 = arith.addf %89, %88 : vector<8x128xf32>
    %91 = arith.mulf %85, %90 : vector<8x128xf32>
    %cst_26 = arith.constant dense<0.000000e+00> : vector<8xf32>
    %92 = vector.multi_reduction <add>, %91, %cst_26 [1] : vector<8x128xf32> to vector<8xf32>
    %93 = vector.shape_cast %92 : vector<8xf32> to vector<8x1xf32>
    %94 = arith.mulf %91, %91 : vector<8x128xf32>
    %cst_27 = arith.constant dense<0.000000e+00> : vector<8xf32>
    %95 = vector.multi_reduction <add>, %94, %cst_27 [1] : vector<8x128xf32> to vector<8xf32>
    %96 = vector.shape_cast %95 : vector<8xf32> to vector<8x1xf32>
    %cst_28 = arith.constant 7.812500e-03 : f32
    %97 = vector.broadcast %cst_28 : f32 to vector<8x1xf32>
    %98 = arith.mulf %93, %97 : vector<8x1xf32>
    %cst_29 = arith.constant 7.812500e-03 : f32
    %99 = vector.broadcast %cst_29 : f32 to vector<8x1xf32>
    %100 = arith.mulf %96, %99 : vector<8x1xf32>
    %101 = arith.mulf %98, %98 : vector<8x1xf32>
    %102 = arith.subf %100, %101 : vector<8x1xf32>
    %cst_30 = arith.constant 0.000000e+00 : f32
    %103 = vector.broadcast %cst_30 : f32 to vector<8x1xf32>
    %104 = arith.maximumf %102, %103 : vector<8x1xf32>
    %cst_31 = arith.constant 9.99999996E-13 : f32
    %105 = vector.broadcast %cst_31 : f32 to vector<8x1xf32>
    %106 = arith.addf %104, %105 : vector<8x1xf32>
    %107 = math.rsqrt %106 : vector<8x1xf32>
    %108 = vector.broadcast %98 : vector<8x1xf32> to vector<8x128xf32>
    %109 = arith.subf %91, %108 : vector<8x128xf32>
    %110 = vector.broadcast %107 : vector<8x1xf32> to vector<8x128xf32>
    %111 = arith.mulf %109, %110 : vector<8x128xf32>
    %c0_32 = arith.constant 0 : index
    %c0_33 = arith.constant 0 : index
    %112 = vector.load %arg7[%c0_32, %c0_33] : memref<1x128xf32, #tpu.memory_space<vmem>>, vector<1x128xf32>
    %113 = vector.broadcast %112 : vector<1x128xf32> to vector<8x128xf32>
    %114 = arith.mulf %111, %113 : vector<8x128xf32>
    %c0_34 = arith.constant 0 : index
    %c0_35 = arith.constant 0 : index
    %115 = vector.load %arg8[%c0_34, %c0_35] : memref<1x128xf32, #tpu.memory_space<vmem>>, vector<1x128xf32>
    %116 = vector.broadcast %115 : vector<1x128xf32> to vector<8x128xf32>
    %117 = arith.addf %114, %116 : vector<8x128xf32>
    %c0_36 = arith.constant 0 : index
    %c0_37 = arith.constant 0 : index
    %c0_38 = arith.constant 0 : index
    %118 = vector.load %arg9[%c0_36, %c0_37, %c0_38] : memref<1x8x128xf32, #tpu.memory_space<vmem>>, vector<1x8x128xf32>
    %119 = vector.shape_cast %118 : vector<1x8x128xf32> to vector<8x128xf32>
    %120 = vector.shape_cast %117 : vector<8x128xf32> to vector<1x8x128xf32>
    tpu.vector_store %arg9[%c0_36, %c0_37, %c0_38], %120 {strides = array<i32>} : memref<1x8x128xf32, #tpu.memory_space<vmem>>, vector<1x8x128xf32>,
    return
  }
  func.func @transform_0(%arg0: i32, %arg1: i32) -> (i32, i32, i32) {
    %c0_i32 = arith.constant 0 : i32
    %c0_i32_0 = arith.constant 0 : i32
    return %arg1, %arg0, %c0_i32 : i32, i32, i32
  }
  func.func @transform_1(%arg0: i32, %arg1: i32) -> (i32, i32, i32) {
    %c1_i32 = arith.constant 1 : i32
    %0 = arith.muli %arg0, %c1_i32 : i32
    %c1_i32_0 = arith.constant 1 : i32
    %1 = arith.subi %0, %c1_i32_0 : i32
    %c0_i32 = arith.constant 0 : i32
    %2 = arith.maxsi %1, %c0_i32 : i32
    %c0_i32_1 = arith.constant 0 : i32
    %c0_i32_2 = arith.constant 0 : i32
    return %arg1, %2, %c0_i32_1 : i32, i32, i32
  }
  func.func @transform_2(%arg0: i32, %arg1: i32) -> (i32, i32, i32) {
    %c1_i32 = arith.constant 1 : i32
    %0 = arith.addi %arg0, %c1_i32 : i32
    %c1_i32_0 = arith.constant 1 : i32
    %1 = arith.muli %0, %c1_i32_0 : i32
    %c0_i32 = arith.constant 0 : i32
    %2 = arith.minsi %1, %c0_i32 : i32
    %c0_i32_1 = arith.constant 0 : i32
    %c0_i32_2 = arith.constant 0 : i32
    return %arg1, %2, %c0_i32_1 : i32, i32, i32
  }
  func.func @transform_3(%arg0: i32, %arg1: i32) -> (i32, i32, i32) {
    %c0_i32 = arith.constant 0 : i32
    %c0_i32_0 = arith.constant 0 : i32
    %c0_i32_1 = arith.constant 0 : i32
    return %c0_i32, %arg0, %c0_i32_0 : i32, i32, i32
  }
  func.func @transform_4(%arg0: i32, %arg1: i32) -> i32 {
    %c0_i32 = arith.constant 0 : i32
    %c0_i32_0 = arith.constant 0 : i32
    return %c0_i32 : i32
  }
  func.func @transform_5(%arg0: i32, %arg1: i32) -> (i32, i32) {
    %c0_i32 = arith.constant 0 : i32
    %c0_i32_0 = arith.constant 0 : i32
    %c0_i32_1 = arith.constant 0 : i32
    return %c0_i32, %c0_i32_0 : i32, i32
  }
  func.func @transform_6(%arg0: i32, %arg1: i32) -> (i32, i32) {
    %c0_i32 = arith.constant 0 : i32
    %c0_i32_0 = arith.constant 0 : i32
    %c0_i32_1 = arith.constant 0 : i32
    return %c0_i32, %c0_i32_0 : i32, i32
  }
  func.func @transform_7(%arg0: i32, %arg1: i32) -> (i32, i32, i32) {
    %c0_i32 = arith.constant 0 : i32
    %c0_i32_0 = arith.constant 0 : i32
    return %arg1, %arg0, %c0_i32 : i32, i32, i32
  }
}

</mosaic_0001>

<bundles_post_ra>
// kernel: tpu_custom_call.1
= control target key start
LH: loop header
LB: loop body
LE: loop exit
PB: predicated region body
PF: predicated region fallthrough
CT: control target
= control target key end

     0   :  { %s1384_s0 = inlined_call_operand.hbm [shape: f32[2,8,128], index: 0, kind: input, shape index: {}]   ;;  %s1385_s1 = inlined_call_operand.hbm [shape: f32[2,8,128], index: 1, kind: input, shape index: {}]   ;;  %s1386_s2 = inlined_call_operand.hbm [shape: f32[2,8,128], index: 2, kind: input, shape index: {}]   ;;  %s1387_s3 = inlined_call_operand.vmem [shape: f32[1,8,128], index: 3, kind: input, shape index: {}]   ;;  %s1388_s4 = inlined_call_operand.vmem [shape: f32[9], index: 4, kind: input, shape index: {}]   ;;  %s1389_s5 = inlined_call_operand.vmem [shape: f32[1,128], index: 5, kind: input, shape index: {}]   ;;  %s1390_s6 = inlined_call_operand.vmem [shape: f32[1,128], index: 6, kind: input, shape index: {}]   ;;  %s1391_s7 = inlined_call_operand.hbm [shape: f32[2,8,128], index: 7, kind: output, shape index: {}]  }
   0x1   :  { %1408 = sst [smem:[#allocation22_spill]] %s1385_s1 }
   0x2   :  { %1409 = sst [smem:[#allocation23_spill]] %s1388_s4 }
   0x3   :  { %12 = vsyncpa [#allocation3], 0 }
   0x4   :  { %14 = vsyncpa [#allocation3 + $0x1], 0 }
   0x5   :  { %15 = vsyncpa [#allocation7], 0 }
   0x6   :  { %17 = vsyncpa [#allocation7 + $0x1], 0 }
   0x7   :  { %18 = vsyncpa [#allocation5], 0 }
   0x8   :  { %19 = vsyncpa [#allocation4], 0 }
   0x9   :  { %21 = vsyncpa [#allocation4 + $0x1], 0  ;;  %s1093_s24 = smov 0   ;;  %s1095_s25 = smov 0  }
   0xa   :  { %s1097_s26 = smov 0   ;;  %s1099_s27 = smov 0  }
   0xb   :  { %s1101_s28 = smov 0   ;;  %s1103_s29 = smov 0  }
   0xc LB: > { %1410 = sst [smem:[#allocation15_spill]] %s1024_s24  ;;  %s36_s30 = sadd.s32 1, %s1040_s28  ;;  %s1044_s29 = sphi %s1103_s29, %s27_s29   ;;  %s1040_s28 = sphi %s1101_s28, %s1444_s28   ;;  %s1036_s27 = sphi %s1099_s27, %s1443_s27   ;;  %s1032_s26 = sphi %s1097_s26, %s1442_s26   ;;  %s1028_s25 = sphi %s1095_s25, %s1446_s25   ;;  %s1024_s24 = sphi %s1093_s24, %s1445_s24  }
   0xd   : > { %1411 = sst [smem:[#allocation16_spill]] %s1032_s26  ;;  %s48_s8 = sadd.s32 1, %s1032_s26 }
   0xe   : > { %1412 = sst [smem:[#allocation17_spill]] %s1040_s28  ;;  %p37_p0 = scmp.ge.s32.totalorder %s36_s30, 2 }
   0xf   : > { %1413 = sst [smem:[#allocation18_spill]] %s1044_s29  ;;  %p1392_p1 = scmp.ne.s32.totalorder %s1032_s26, %s1028_s25 }
  0x10   : > { %p56_p2 = scmp.eq.s32.totalorder %s1044_s29, 0  ;;  %s1448_s30 = smov (%p37_p0, %s36_s30), 0 }
  0x11   : > { %1414 = sst [smem:[#allocation19_spill]] %s1448_s30  ;;  %p791_p5 = scmp.lt.s32.totalorder %s1044_s29, 2 }
  0x12   : > { %p57_p4 = por %p56_p2, %p1392_p1  ;;  %s43_s9 = ssub.s32 %s1040_s28, %s1448_s30 }
  0x13   : > { %s1393_s10 = sand.u32 1, %s1032_s26   ;;  %p46_p6 = scmp.eq.s32.totalorder %s43_s9, 0 }
  0x14   : > { %s1140_s11 = sshll.u32 %s1393_s10, 3  ;;  %s1143_s12 = sshll.u32 %s1040_s28, 7 }
  0x15   : > { %p1145_p7 = pnand %p791_p5, %p57_p4  ;;  %s313_s15 = sand.u32 1, %s1044_s29  }
  0x16   : > { %s1150_s14 = scalar_select %p46_p6, %s1032_s26, %s48_s8  }
  0x17   : > { %s1415_s13 = scalar_select %p1145_p7, 1, 0 }
  0x18   : > { %1416 = sst [smem:[#allocation20_spill]] %s1150_s14  ;;  %s1417_s1 = sld [smem:[#allocation22_spill]] }
  0x19   : > { %s317_s19 = scalar_lea.vmem [#allocation6], %s1140_s11  ;;  %s1162_s21 = scalar_lea.sflag [#allocation7], %s313_s15 }
  0x1a   : > { %s328_s20 = sshll.u32 %s317_s19, 4  ;;  %p1168_p9 = pneg %p1145_p7  ;;  %s1160_s20 = int_to_ptr.vmem [resolvable:$true] %s328_s20 }
  0x1e   : > { %s1157_s18 = scalar_lea.hbm %s1417_s1, %s1143_s12  ;;  %s854_s16 = scalar_lea.hbm %s1417_s1, 256 }
  0x1f   : > { %s849_s22 = scalar_lea.hbm %s1157_s18, 128  ;;  %p855_p12 = scmp.lt.u32.totalorder %s1157_s18, %s1417_s1 }
  0x20   : > { %p850_p8 = scmp.ne.s32.totalorder %s1157_s18, %s849_s22  ;;  %p856_p13 = scmp.lt.u32.totalorder %s854_s16, %s849_s22 }
  0x21   : > { %p858_p2 = scmp.lt.u32.totalorder %s849_s22, %s1157_s18 }
  0x22   : > { %p852_p10 = pnand %p1168_p9, %p850_p8  ;;  %p857_p0 = por %p856_p13, %p855_p12 }
  0x24   : > { %p853_p11 = pneg %p852_p10  ;;  %p859_p4 = por %p858_p2, %p857_p0 }
  0x26   : > { %p860_p5 = pnand %p859_p4, %p853_p11 }
  0x28   : > { %863 = shalt.err (!%p860_p5)
}
  0x29   : > { %s864_s15 = scalar_lea.vmem %s1160_s20, 128  ;;  %s1046_s8 = smov [#allocation6]  }
  0x2a   : > { %p865_p6 = scmp.ne.s32.totalorder %s1160_s20, %s864_s15  ;;  %s869_s9 = sshll.u32 %s1046_s8, 4  ;;  %s870_s9 = int_to_ptr.vmem [resolvable:$false] %s869_s9 }
  0x2b   : > { %s871_s17 = scalar_lea.vmem %s870_s9, 256  ;;  %p872_p3 = scmp.lt.s32.totalorder %s1160_s20, %s870_s9 }
  0x2c   : > { %p867_p8 = pnand %p865_p6, %p1168_p9  ;;  %p873_p1 = scmp.lt.s32.totalorder %s871_s17, %s864_s15 }
  0x2e   : > { %p868_p10 = pneg %p867_p8  ;;  %p874_p12 = por %p873_p1, %p872_p3 }
  0x30   : > { %p875_p13 = pnand %p874_p12, %p868_p10 }
  0x32   : > { %878 = shalt.err (!%p875_p13)
}
  0x33   : > { %782 = dma.hbm_to_vmem [thread:$0]  (!%p1145_p7), %s1157_s18, 128, %s1160_s20, %s1162_s21  }
  0x34   : > { %s1193_s22 = sadd.s32 4294967295, %s1044_s29   ;;  %s729_s16 = sadd.s32 4294967294, %s1044_s29  }
  0x35   : > { %p61_p1 = scmp.ne.s32.totalorder %s1028_s25, %s1024_s24  ;;  %p1400_p3 = scmp.eq.s32.totalorder %s1193_s22, 0 }
  0x36   : > { %p244_p11 = scmp.eq.s32.totalorder %s1193_s22, 1  ;;  %p250_p0 = scmp.eq.s32.totalorder %s729_s16, 1 }
  0x37   : > { %p730_p2 = scmp.ge.s32.totalorder %s1044_s29, 1  ;;  %p1203_p4 = por %p1400_p3, %p61_p1 }
  0x38   : > { %p1420_p5 = scmp.ne.s32.totalorder %s1032_s26, %s1028_s25  ;;  %p1214_p8 = por %p250_p0, %p61_p1 }
  0x39   : > { %s1419_s19 = scalar_select %p1203_p4, 1, 0 }
  0x3a   : > { %p1210_p6 = por %p244_p11, %p1420_p5  ;;  %p257_p10 = scmp.lt.s32.totalorder %s1044_s29, 3 }
  0x3b   : > { %s1422_s20 = scalar_select %p1214_p8, 1, 0 }
  0x3c   : > { %s1421_s18 = scalar_select %p1210_p6, 1, 0 }
  0x3d   : > { %1423 = sst [smem:[#allocation21_spill]] %s1422_s20  ;;  %s1424_s4 = sld [smem:[#allocation23_spill]] }
  0x3e   : > { %p1222_p12 = pnand %p730_p2, %p257_p10  ;;  %s1234_s1 = scalar_lea.hbm %s1384_s0, %s1143_s12 }
  0x3f   : > { %s298_s15 = scalar_lea.vmem [#allocation2], %s1140_s11  ;;  %s1427_s30 = sand.u32 1, %s1032_s26  }
  0x40   : > { %s1425_s17 = scalar_select %p1222_p12, 1, 0 }
  0x41   : > { %p772_p13 = pneg %p1222_p12  ;;  %s306_s8 = sshll.u32 %s298_s15, 4  ;;  %s307_s8 = int_to_ptr.vmem [resolvable:$true] %s306_s8 }
  0x42   : > { %s295_s28 = scalar_lea.sflag [#allocation3], %s1427_s30  ;;  %s879_s14 = scalar_lea.hbm %s1234_s1, 128 }
  0x43   : > { %s277_s9 = sshll.u32 %s1424_s4, 4  ;;  %p1239_p1 = pnand %p772_p13, %p1400_p3  ;;  %s1226_s9 = int_to_ptr.vmem [resolvable:$true] %s277_s9 }
  0x44   : > { %p880_p11 = scmp.ne.s32.totalorder %s1234_s1, %s879_s14  ;;  %s884_s29 = scalar_lea.hbm %s1384_s0, 256 }
  0x45   : > { %s1426_s4 = scalar_select %p1239_p1, 1, 0 }
  0x46   : > { %p882_p0 = pnand %p880_p11, %p1168_p9  ;;  %p885_p5 = scmp.lt.u32.totalorder %s1234_s1, %s1384_s0 }
  0x47   : > { %p886_p10 = scmp.lt.u32.totalorder %s884_s29, %s879_s14  ;;  %p888_p3 = scmp.lt.u32.totalorder %s879_s14, %s1234_s1 }
  0x48   : > { %p883_p2 = pneg %p882_p0 }
  0x49   : > { %p887_p13 = por %p886_p10, %p885_p5 }
  0x4b   : > { %p889_p8 = por %p888_p3, %p887_p13 }
  0x4d   : > { %p890_p6 = pnand %p889_p8, %p883_p2 }
  0x4f   : > { %893 = shalt.err (!%p890_p6)
}
  0x50   : > { %s894_s30 = scalar_lea.vmem %s307_s8, 128  ;;  %s1047_s15 = smov [#allocation2]  }
  0x51   : > { %p895_p4 = scmp.ne.s32.totalorder %s307_s8, %s894_s30  ;;  %s899_s26 = sshll.u32 %s1047_s15, 4  ;;  %s900_s26 = int_to_ptr.vmem [resolvable:$false] %s899_s26 }
  0x52   : > { %s901_s10 = scalar_lea.vmem %s900_s26, 256  ;;  %p902_p12 = scmp.lt.s32.totalorder %s307_s8, %s900_s26 }
  0x53   : > { %p897_p11 = pnand %p895_p4, %p1168_p9  ;;  %p903_p1 = scmp.lt.s32.totalorder %s901_s10, %s894_s30 }
  0x55   : > { %p898_p0 = pneg %p897_p11  ;;  %p904_p7 = por %p903_p1, %p902_p12 }
  0x57   : > { %p905_p5 = pnand %p904_p7, %p898_p0 }
  0x59   : > { %908 = shalt.err (!%p905_p5)
}
  0x5a   : > { %p1428_p10 = scmp.ne.s32.totalorder %s1415_s13, 0  ;;  %s909_s24 = scalar_lea.vmem %s1226_s9, 16 }
  0x5b   : > { %p910_p3 = scmp.ne.s32.totalorder %s1226_s9, %s909_s24  ;;  %p1429_p4 = scmp.ne.s32.totalorder %s1426_s4, 0 }
  0x5c   : > { %779 = dma.hbm_to_vmem [thread:$0]  (!%p1428_p10), %s1234_s1, 128, %s307_s8, %s295_s28  }
  0x5d   : > { %p911_p6 = pneg %p1429_p4  ;;  %p917_p13 = scmp.lt.s32.totalorder %s1226_s9, %s1226_s9 }
  0x5e   : > { %p918_p11 = scmp.lt.s32.totalorder %s909_s24, %s909_s24 }
  0x5f   : > { %p912_p8 = pnand %p911_p6, %p910_p3 }
  0x60   : > { %p919_p12 = por %p918_p11, %p917_p13 }
  0x61   : > { %p913_p2 = pneg %p912_p8 }
  0x63   : > { %p920_p7 = pnand %p919_p12, %p913_p2 }
  0x65   : > { %923 = shalt.err (!%p920_p7)
}
  0x66   : > { %s1048_s26 = smov [#allocation9]   ;;  %s1275_s29 = scalar_lea.hbm %s1386_s2, %s1143_s12 }
  0x67   : > { %775 = dma.vmem_to_smem (!%p1429_p4), %s1226_s9, 16, %s1048_s26, [#allocation5]  }
  0x68   : > { %s339_s14 = scalar_lea.vmem [#allocation8], %s1140_s11  ;;  %s924_s8 = scalar_lea.hbm %s1275_s29, 128 }
  0x69   : > { %s350_s20 = sshll.u32 %s339_s14, 4  ;;  %p925_p1 = scmp.ne.s32.totalorder %s1275_s29, %s924_s8  ;;  %s351_s20 = int_to_ptr.vmem [resolvable:$true] %s350_s20 }
  0x6a   : > { %s929_s9 = scalar_lea.hbm %s1386_s2, 256  ;;  %p930_p3 = scmp.lt.u32.totalorder %s1275_s29, %s1386_s2 }
  0x6b   : > { %p927_p0 = pnand %p925_p1, %p1168_p9  ;;  %p931_p4 = scmp.lt.u32.totalorder %s929_s9, %s924_s8 }
  0x6c   : > { %p933_p8 = scmp.lt.u32.totalorder %s924_s8, %s1275_s29 }
  0x6d   : > { %p928_p5 = pneg %p927_p0  ;;  %p932_p6 = por %p931_p4, %p930_p3 }
  0x6f   : > { %p934_p2 = por %p933_p8, %p932_p6 }
  0x71   : > { %p935_p13 = pnand %p934_p2, %p928_p5 }
  0x73   : > { %938 = shalt.err (!%p935_p13)
}
  0x74   : > { %s939_s11 = scalar_lea.vmem %s351_s20, 128  ;;  %s1049_s12 = smov [#allocation8]  }
  0x75   : > { %p940_p11 = scmp.ne.s32.totalorder %s351_s20, %s939_s11  ;;  %s944_s10 = sshll.u32 %s1049_s12, 4  ;;  %s945_s10 = int_to_ptr.vmem [resolvable:$false] %s944_s10 }
  0x76   : > { %s946_s24 = scalar_lea.vmem %s945_s10, 256  ;;  %p947_p1 = scmp.lt.s32.totalorder %s351_s20, %s945_s10 }
  0x77   : > { %p942_p12 = pnand %p940_p11, %p1168_p9  ;;  %p948_p0 = scmp.lt.s32.totalorder %s946_s24, %s939_s11 }
  0x79   : > { %p943_p7 = pneg %p942_p12  ;;  %p949_p10 = por %p948_p0, %p947_p1 }
  0x7b   : > { %p950_p3 = pnand %p949_p10, %p943_p7 }
  0x7d   : > { %953 = shalt.err (!%p950_p3)
}
  0x7e   : > { %p1430_p4 = scmp.ne.s32.totalorder %s1415_s13, 0  ;;  %p1431_p5 = scmp.ne.s32.totalorder %s1425_s17, 0 }
  0x7f   : > { %s1299_s23 = sand.u32 (!%p1431_p5), 1, %s1028_s25   ;;  %p1432_p9 = scmp.ne.s32.totalorder (!%p1431_p5), %s1419_s19, 0 }
  0x80   : > { %785 = dma.hbm_to_vmem [thread:$0]  (!%p1430_p4), %s1275_s29, 128, %s351_s20, %s1162_s21  }
  0x81   : > { %359 = sbr.rel (%p1431_p5) target bundleno = 485 (0x1e5), region = 48  ;;  %s1302_s26 = sshll.u32 (!%p1431_p5), %s1299_s23, 3 }
  0x82   : > { %s362_s1 = scalar_lea.sflag (!%p1431_p5), [#allocation3], %s1299_s23  ;;  %s365_s28 = scalar_lea.vmem (!%p1431_p5), [#allocation2], %s1302_s26 }
  0x88   : > { %1007 = dma.done.wait (%p1432_p9), %s362_s1, 128  }
  0x89   : > { %1009 = vsyncadd (%p1432_p9), %s362_s1, 4294967168  ;;  %s370_s13 = sand.u32 1, %s1193_s22   ;;  %s374_s17 = scalar_lea.vmem [#allocation6], %s1302_s26 }
  0x8a   : > { %s371_s21 = scalar_lea.sflag [#allocation7], %s370_s13 }
  0x8b   : > { %1011 = dma.done.wait (%p1432_p9), %s371_s21, 256  }
  0x8c   : > { %1013 = vsyncadd (%p1432_p9), %s371_s21, 4294967040  ;;  %s383_s29 = scalar_lea.vmem [#allocation8], %s1302_s26  ;;  %p1433_p10 = scmp.eq.s32.totalorder %s1193_s22, 0 }
  0x8e   : > { %1015 = dma.done.wait (%p1433_p10), [#allocation5], 16   ;;  %p1434_p6 = pmov %p1433_p10 }
  0x90   : > { %1017 = vsyncadd (%p1434_p6), [#allocation5], 4294967280 }
  0x91   : > { %392 = sfence }
  0x92   : > { %v445_v0 = vld [vmem:[%s374_s17 + $0x7] sm:$0x1]  ;;  %v450_v1 = vld [vmem:[%s383_s29] sm:$0x1]  ;;  %v455_v2 = vlaneseq  ;;  %s477_s14 = sld [smem:[#allocation9]]  ;;  %s746_s20 = sld [smem:[#allocation9 + $0x3]] }
  0x93   : > { %v443_v3 = vld [vmem:[%s365_s28] sm:$0xff]  ;;  %v449_v4 = vmul.f32 0.0, %v445_v0  ;;  %v454_v5 = vmul.f32 0.0, %v450_v1  ;;  %s747_s19 = sld [smem:[#allocation9 + $0x6]]  ;;  %s751_s8 = sld [smem:[#allocation9 + $0x2]] }
  0x94   : > { %v456_v6 = vshrl.u32 %v455_v2, 7  ;;  %s752_s4 = sld [smem:[#allocation9 + $0x5]]  ;;  %v459_v7 = vrot.slane %v443_v3, 7  ;;  %v468_v9 = vrot.slane %v443_v3, 1  ;;  %s753_s16 = sld [smem:[#allocation9 + $0x8]]  ;;  %v458_v38 = vand.u32 127, %v455_v2 }
  0x95   : > { %s748_s22 = sld [smem:[#allocation9 + $0x1]]  ;;  %s749_s9 = sld [smem:[#allocation9 + $0x4]]  ;;  %v444_v39 = vld [vmem:[%s1387_s3] sm:$0xff] }
  0x96   : > { %v465_v8 = vsub.s32 0, %v456_v6  ;;  %vm460_vm0 = vcmp.eq.s32.totalorder %v456_v6, 0  ;;  %vm469_vm1 = vcmp.eq.s32.totalorder %v456_v6, 7  ;;  %s750_s30 = sld [smem:[#allocation9 + $0x7]]  ;;  %s1050_s15 = smov 1   ;;  %vm512_vm2 = vcmp.eq.s32.totalorder %v458_v38, 0 }
  0x97   : > { %s1051_s11 = smov 127   ;;  %vm518_vm3 = vcmp.eq.s32.totalorder %v458_v38, 127  ;;  %v754_v63 = vld [vmem:[%s1389_s5] ss:$0 sm:$0xff]  ;;  %s757_s21 = sshll.u32 %s1036_s27, 7 }
  0x98   : > { %v466_v10 = vrot.slane %v449_v4, %v465_v8  ;;  %v475_v11 = vrot.slane %v454_v5, %v465_v8  ;;  %v478_v12 = vstv %s477_s14  ;;  %v481_v15 = vstv %s746_s20  ;;  %v755_v1 = vld [vmem:[%s1390_s6] ss:$0 sm:$0xff]  ;;  %s432_s17 = scalar_lea.vmem [#allocation10], %s1302_s26  ;;  %p1435_p2 = scmp.ne.s32.totalorder %s1421_s18, 0 }
  0x99   : > { %v485_v16 = vstv %s747_s19  ;;  %v482_v18 = vmul.f32 %v481_v15, %v443_v3  ;;  %v500_v20 = vstv %s751_s8  ;;  %s576_s29 = sshll.u32 %s432_s17, 4  ;;  %s1335_s19 = scalar_lea.hbm %s1391_s7, %s757_s21  ;;  %s1337_s29 = int_to_ptr.vmem [resolvable:$true] %s576_s29 }
  0x9a   : > { %v467_v13 = vsel %vm460_vm0, %v466_v10, %v459_v7  ;;  %v476_v14 = vsel %vm469_vm1, %v475_v11, %v468_v9  ;;  %v503_v22 = vstv %s752_s4  ;;  %v507_v23 = vstv %s753_s16  ;;  %s562_s8 = scalar_lea.sflag [#allocation4], %s1299_s23  ;;  %s954_s4 = scalar_lea.vmem %s1337_s29, 128 }
  0x9b   : > { %v479_v17 = vmul.f32 %v478_v12, %v467_v13  ;;  %v486_v19 = vmul.f32 %v485_v16, %v476_v14  ;;  %v501_v21 = vmul.f32 %v500_v20, %v467_v13  ;;  %v504_v25 = vmul.f32 %v503_v22, %v443_v3  ;;  %p955_p8 = scmp.ne.s32.totalorder %s1337_s29, %s954_s4  ;;  %s1052_s27 = smov [#allocation10]  }
  0x9c   : > { %v508_v26 = vmul.f32 %v507_v23, %v476_v14  ;;  %v489_v27 = vstv %s748_s22  ;;  %v492_v29 = vstv %s749_s9  ;;  %v496_v30 = vstv %s750_s30  ;;  %s958_s26 = sshll.u32 %s1052_s27, 4  ;;  %s959_s26 = int_to_ptr.vmem [resolvable:$false] %s958_s26 }
  0x9d   : > { %v483_v24 = vadd.f32 %v482_v18, %v479_v17  ;;  %v490_v28 = vmul.f32 %v489_v27, %v467_v13  ;;  %v505_v32 = vadd.f32 %v504_v25, %v501_v21  ;;  %v493_v33 = vmul.f32 %v492_v29, %v443_v3  ;;  %p956_p13 = pnand %p955_p8, %p1435_p2  ;;  %s960_s16 = scalar_lea.vmem %s959_s26, 256 }
  0x9e   : > { %v497_v34 = vmul.f32 %v496_v30, %v476_v14  ;;  %p961_p12 = scmp.lt.s32.totalorder %s1337_s29, %s959_s26  ;;  %p962_p7 = scmp.lt.s32.totalorder %s960_s16, %s954_s4 }
  0x9f   : > { %v487_v31 = vadd.f32 %v486_v19, %v483_v24  ;;  %v509_v35 = vadd.f32 %v508_v26, %v505_v32  ;;  %v494_v36 = vadd.f32 %v493_v33, %v490_v28  ;;  %p957_p11 = pneg %p956_p13 }
  0xa0   : > { %p963_p1 = por %p962_p7, %p961_p12 }
  0xa1   : > { %510 = vrot.lane.b32.xlu0 %v487_v31, %s1050_s15  ;;  %v498_v37 = vadd.f32 %v497_v34, %v494_v36 }
  0xa2   : > { %p964_p0 = pnand %p963_p1, %p957_p11 }
  0xa3   : > { %v522_v40 = vadd.f32 %v498_v37, %v444_v39 }
  0xa5   : > { %516 = vrot.lane.b32.xlu0 %v509_v35, %s1051_s11 }
 0x113   : > { %v511_v41 = vpop.permute.xlu0 %510 }
 0x114   : > { %v515_v42 = vsel %vm512_vm2, 0.0, %v511_v41 }
 0x115   : > { %v523_v43 = vadd.f32 %v522_v40, %v515_v42 }
 0x117   : > { %v517_v44 = vpop.permute.xlu0 %516 }
 0x118   : > { %v521_v45 = vsel %vm518_vm3, 0.0, %v517_v44 }
 0x119   : > { %v524_v46 = vadd.f32 %v523_v43, %v521_v45 }
 0x11b   : > { %v526_v47 = vmul.f32 0.70710677, %v524_v46  ;;  %v525_v49 = vmul.f32 0.5, %v524_v46 }
 0x11d   : > { %845 = verf.f32 %v526_v47 }
 0x127   : > { %v846_v48 = vpop.eup %845 }
 0x128   : > { %v528_v50 = vadd.f32 1.0, %v846_v48 }
 0x12a   : > { %v529_v51 = vmul.f32 %v528_v50, %v525_v49 }
 0x12c   : > { %530 = vadd.xlane.f32.xlu1 %v529_v51  ;;  %v532_v52 = vmul.f32 %v529_v51, %v529_v51 }
 0x130   : > { %533 = vadd.xlane.f32.xlu1 %v532_v52 }
 0x1b9   : > { %v531_v53 = vpop.xlane.xlu1 %530 }
 0x1ba   : > { %v535_v54 = vmul.f32 0.0078125, %v531_v53 }
 0x1bc   : > { %v537_v56 = vmul.f32 %v535_v54, %v535_v54  ;;  %v542_v61 = vsub.f32 %v529_v51, %v535_v54 }
 0x1bd   : > { %v534_v55 = vpop.xlane.xlu1 %533 }
 0x1be   : > { %v536_v57 = vmul.f32 0.0078125, %v534_v55 }
 0x1c0   : > { %v538_v58 = vsub.f32 %v536_v57, %v537_v56 }
 0x1c2   : > { %v539_v59 = vmax.f32 %v538_v58, 0.0 }
 0x1c4   : > { %v540_v60 = vadd.f32 1e-12, %v539_v59 }
 0x1c6   : > { %847 = vrsqrt.f32 %v540_v60 }
 0x1d0   : > { %v848_v62 = vpop.eup %847 }
 0x1d1   : > { %v543_v0 = vmul.f32 %v848_v62, %v542_v61 }
 0x1d3   : > { %v551_v2 = vmul.f32 %v754_v63, %v543_v0 }
 0x1d5   : > { %v559_v3 = vadd.f32 %v755_v1, %v551_v2 }
 0x1d7   : > { %560 = vst [vmem:[%s432_s17] sm:$0xff] %v559_v3 }
 0x1d8   : > { %967 = shalt.err (!%p964_p0)
}
 0x1d9   : > { %s968_s23 = scalar_lea.hbm %s1335_s19, 128  ;;  %s972_s30 = scalar_lea.hbm %s1391_s7, 256 }
 0x1da   : > { %p969_p3 = scmp.ne.s32.totalorder %s1335_s19, %s968_s23  ;;  %p973_p9 = scmp.lt.u32.totalorder %s1335_s19, %s1391_s7 }
 0x1db   : > { %p974_p10 = scmp.lt.u32.totalorder %s972_s30, %s968_s23  ;;  %p976_p8 = scmp.lt.u32.totalorder %s968_s23, %s1335_s19 }
 0x1dc   : > { %p970_p4 = pnand %p969_p3, %p1435_p2 }
 0x1dd   : > { %p975_p6 = por %p974_p10, %p973_p9 }
 0x1de   : > { %p971_p5 = pneg %p970_p4 }
 0x1df   : > { %p977_p13 = por %p976_p8, %p975_p6 }
 0x1e1   : > { %p978_p11 = pnand %p977_p13, %p971_p5 }
 0x1e3   : > { %981 = shalt.err (!%p978_p11)
}
 0x1e4   : > { %770 = dma.vmem_to_hbm [thread:$0]  (%p1435_p2), %s1337_s29, 128, %s1335_s19, %s562_s8  }
 0x1e5 PF: > { %s1436_s12 = sld [smem:[#allocation15_spill]]  ;;  %s1437_s10 = sld [smem:[#allocation21_spill]] }
 0x1e6   : > { %s1438_s24 = sld [smem:[#allocation18_spill]] }
 0x1eb   : > { %s588_s1 = sand.u32 1, %s1436_s12   ;;  %p1439_p12 = scmp.ne.s32.totalorder %s1437_s10, 0 }
 0x1ec   : > { %p1440_p7 = scmp.ge.s32.totalorder %s1438_s24, 2  ;;  %s589_s28 = scalar_lea.sflag [#allocation4], %s588_s1 }
 0x1ee   : > { %p787_p1 = pnand %p1440_p7, %p1439_p12 }
 0x1f0   : > { %1019 = dma.done.wait (!%p787_p1), %s589_s28, 128  }
 0x1f1   : > { %1021 = vsyncadd (!%p787_p1), %s589_s28, 4294967168  ;;  %s27_s29 = sadd.s32 1, %s1438_s24   ;;  %s1441_s13 = sld [smem:[#allocation16_spill]] }
 0x1f2   : > { %p24_p0 = scmp.ge.s32.totalorder %s27_s29, 4   ;;  %s1442_s26 = sld [smem:[#allocation20_spill]] }
 0x1f3   : > { %s1443_s27 = sld [smem:[#allocation17_spill]]  ;;  %s1444_s28 = sld [smem:[#allocation19_spill]] }
 0x1f4   : > { %s1445_s24 = smov %s1028_s25  ;;  %26 = sbr.rel (!%p24_p0) target bundleno = 12 (0xc), region = 125 }
 0x1f7   : > { %s1446_s25 = smov %s1441_s13 }
 0x1fb   :  { %594 = vsyncpa [#allocation3], 1 }
 0x1fc   :  { %596 = vsyncpa [#allocation3 + $0x1], 1 }
 0x1fd   :  { %597 = vsyncpa [#allocation7], 1 }
 0x1fe   :  { %599 = vsyncpa [#allocation7 + $0x1], 1 }
 0x1ff   :  { %600 = vsyncpa [#allocation4], 1 }
 0x200   :  { %602 = vsyncpa [#allocation4 + $0x1], 1 }
 0x201   :  { %603 = vsyncpa [#allocation5], 1 }
 0x202   :  { %605 = vsyncpa [#allocation5 + $0x1], 1 }

</bundles_post_ra>
